<compile_context>
chip_gen: v7x
topology: tpu7x:2x2x1
jax: 0.10.0
libtpu: 0.0.40
codegen_flags: <defaults>
</compile_context>

<pallas_src>
import functools

import jax
import jax.numpy as jnp
from jax.experimental import pallas as pl
from jax.experimental.pallas import tpu as pltpu


def _pair(v):
    return (v, v) if isinstance(v, int) else tuple(v)


def _round_up(x, m):
    return ((x + m - 1) // m) * m


def _pad_kernel(x_ref, o_ref, *, h_t, h_b, w_l, w_r, value):
    # One block of `bnc` whole images per grid step.
    bnc, Ho, Wo = o_ref.shape
    _, H, W = x_ref.shape

    if h_t == 0 and h_b == 0 and w_l == 0 and w_r == 0:
        o_ref[...] = x_ref[...]
        return

    narrow = Wo <= 128  # every store is lane-masked anyway when W < 128

    if (w_l > 0 or w_r > 0) and narrow:
        # Fewer vst: one full-block constant fill + one interior overwrite
        # beats interior + top/bottom bands + width-<=pad column strips when
        # all stores are masked vst.msk.  (Value is cast to the input dtype,
        # matching F.pad.)
        o_ref[...] = jnp.full((bnc, Ho, Wo), value, dtype=o_ref.dtype)
        o_ref[:, h_t:h_t + H, w_l:w_l + W] = x_ref[...]
        return

    # Wide-W (or H-only) path: straight interior copy + thin border strips
    # (disjoint from the interior; union covers the block).
    o_ref[:, h_t:h_t + H, w_l:w_l + W] = x_ref[...]
    if h_t > 0:
        o_ref[:, :h_t, :] = jnp.full((bnc, h_t, Wo), value, dtype=o_ref.dtype)
    if h_b > 0:
        o_ref[:, h_t + H:, :] = jnp.full((bnc, h_b, Wo), value, dtype=o_ref.dtype)
    if w_l > 0:
        o_ref[:, h_t:h_t + H, :w_l] = jnp.full((bnc, H, w_l), value, dtype=o_ref.dtype)
    if w_r > 0:
        o_ref[:, h_t:h_t + H, w_l + W:] = jnp.full((bnc, H, w_r), value, dtype=o_ref.dtype)


def pad2d_same_pallas(x, padding, value):
    """Constant pad. x: (N, C, H, W); padding = (w_l, w_r, h_t, h_b) as in F.pad."""
    w_l, w_r, h_t, h_b = padding
    if min(padding) < 0:
        # F.pad allows negative pads (cropping); Pad2dSame never produces them.
        raise NotImplementedError("negative (cropping) padding is not supported")

    N, C, H, W = x.shape
    Ho, Wo = H + h_t + h_b, W + w_l + w_r
    if (w_l, w_r, h_t, h_b) == (0, 0, 0, 0):
        return x  # identity, same as F.pad with zero padding

    NC = N * C
    x3 = x.reshape(NC, H, W)  # free view for NCHW layout

    # --- Block sizing ----------------------------------------------------
    # VMEM stores each (bnc, H, W) block as (sub, 128)-tiled slabs; account
    # for that padding (sub = 8 for 4B dtypes, 16 for 2B, 32 for 1B).
    itemsize = jnp.dtype(x.dtype).itemsize
    sub = max(8, 32 // max(itemsize, 1))
    tiled_in = _round_up(H, sub) * _round_up(W, 128)
    tiled_out = _round_up(Ho, sub) * _round_up(Wo, 128)
    # Double-buffered input + output blocks per grid step.
    per_image = 2 * (tiled_in + tiled_out) * itemsize

    budget = 8 * 1024 * 1024  # ~8 MiB per-step footprint is already at roofline
    bnc_max = int(max(1, min(NC, budget // max(per_image, 1))))

    # At least 4 grid steps (when NC allows) so the "parallel" axis can shard
    # across v7x's two TensorCores; round the step count up to even, and even
    # out the block size so the remainder block isn't nearly empty.
    steps = max(pl.cdiv(NC, bnc_max), min(NC, 4))
    if steps > 1 and steps % 2 == 1:
        steps += 1
    bnc = max(1, pl.cdiv(NC, steps))
    grid = (pl.cdiv(NC, bnc),)

    kernel = functools.partial(
        _pad_kernel, h_t=h_t, h_b=h_b, w_l=w_l, w_r=w_r, value=value
    )

    out3 = pl.pallas_call(
        kernel,
        out_shape=jax.ShapeDtypeStruct((NC, Ho, Wo), x.dtype),
        grid=grid,
        in_specs=[pl.BlockSpec((bnc, H, W), lambda i: (i, 0, 0))],
        out_specs=pl.BlockSpec((bnc, Ho, Wo), lambda i: (i, 0, 0)),
        compiler_params=pltpu.CompilerParams(
            dimension_semantics=("parallel",),
            vmem_limit_bytes=32 * 1024 * 1024,  # well under every gen's VMEM
        ),
    )(x3)
    return out3.reshape(N, C, Ho, Wo)


class Pad2dSame:
    """JAX/Pallas port of boardom's Pad2dSame (no learnable parameters)."""

    def __init__(self, kernel_size, dilation=1, mode="constant", value=0):
        dilation = _pair(dilation)
        kernel_size = _pair(kernel_size)
        self.mode = mode
        self.value = value
        total_pad = [d * (k - 1) for d, k in zip(dilation, kernel_size)]
        self.left = [tp // 2 for tp in total_pad]
        self.right = [tp - l for tp, l in zip(total_pad, self.left)]
        # Mirrors the PyTorch module: index 0 drives W (last dim) padding,
        # index 1 drives H padding.
        self.padding = (self.left[0], self.right[0], self.left[1], self.right[1])

    def __call__(self, x):
        if self.mode != "constant":
            # TODO(synk): 'reflect'/'replicate'/'circular' pad modes are not
            # implemented as Pallas kernels here (only 'constant').
            raise NotImplementedError(f"mode={self.mode!r} not supported")
        return pad2d_same_pallas(x, self.padding, self.value)


if __name__ == "__main__":
    key = jax.random.PRNGKey(0)
    x = jax.random.normal(key, (2, 4, 16, 16), dtype=jnp.float32)

    # Case 1: kernel_size=3, dilation=1 -> padding (1, 1, 1, 1).
    mod = Pad2dSame(kernel_size=3, dilation=1, mode="constant", value=0.0)
    y = jax.block_until_ready(mod(x))
    w_l, w_r, h_t, h_b = mod.padding
    ref = jnp.pad(
        x, ((0, 0), (0, 0), (h_t, h_b), (w_l, w_r)),
        mode="constant", constant_values=mod.value,
    )
    assert y.shape == ref.shape, (y.shape, ref.shape)
    assert jnp.allclose(y, ref), "mismatch vs reference pad (symmetric case)"

    # Case 2: asymmetric padding (W padded 1/2, H padded 0/1) and nonzero value.
    mod2 = Pad2dSame(kernel_size=(4, 2), dilation=1, mode="constant", value=2.5)
    y2 = jax.block_until_ready(mod2(x))
    w_l, w_r, h_t, h_b = mod2.padding
    ref2 = jnp.pad(
        x, ((0, 0), (0, 0), (h_t, h_b), (w_l, w_r)),
        mode="constant", constant_values=mod2.value,
    )
    assert y2.shape == ref2.shape, (y2.shape, ref2.shape)
    assert jnp.allclose(y2, ref2), "mismatch vs reference pad (asymmetric case)"

    # Case 3: H-only padding exercises the thin-strip path.
    mod3 = Pad2dSame(kernel_size=(1, 3), dilation=1, mode="constant", value=-1.0)
    y3 = jax.block_until_ready(mod3(x))
    w_l, w_r, h_t, h_b = mod3.padding
    ref3 = jnp.pad(
        x, ((0, 0), (0, 0), (h_t, h_b), (w_l, w_r)),
        mode="constant", constant_values=mod3.value,
    )
    assert y3.shape == ref3.shape, (y3.shape, ref3.shape)
    assert jnp.allclose(y3, ref3), "mismatch vs reference pad (H-only case)"

    print("KERNEL_OK")
</pallas_src>

<mosaic_0001>
module attributes {stable_mosaic.version = 11 : i64} {
  func.func @_pad_kernel(%arg0: i32, %arg1: memref<2x16x16xf32, #tpu.memory_space<vmem>>, %arg2: memref<2x18x18xf32, #tpu.memory_space<vmem>>) attributes {dimension_semantics = [#tpu.dimension_semantics<parallel>], iteration_bounds = array<i64: 4>, scalar_prefetch = 0 : i64, scratch_operands = 0 : i64, tpu.core_type = #tpu.core_type<tc>, window_params = [{transform_indices = @transform_0, window_bounds = array<i64: 2, 16, 16>}, {transform_indices = @transform_1, window_bounds = array<i64: 2, 18, 18>}]} {
    %cst = arith.constant 0.000000e+00 : f32
    %0 = vector.broadcast %cst : f32 to vector<2x18x18xf32>
    %c0 = arith.constant 0 : index
    %c0_0 = arith.constant 0 : index
    %c0_1 = arith.constant 0 : index
    %1 = vector.load %arg2[%c0, %c0_0, %c0_1] : memref<2x18x18xf32, #tpu.memory_space<vmem>>, vector<2x18x18xf32>
    tpu.vector_store %arg2[%c0, %c0_0, %c0_1], %0 {strides = array<i32>} : memref<2x18x18xf32, #tpu.memory_space<vmem>>, vector<2x18x18xf32>,
    %c0_2 = arith.constant 0 : index
    %c0_3 = arith.constant 0 : index
    %c0_4 = arith.constant 0 : index
    %2 = vector.load %arg1[%c0_2, %c0_3, %c0_4] : memref<2x16x16xf32, #tpu.memory_space<vmem>>, vector<2x16x16xf32>
    %c0_5 = arith.constant 0 : index
    %c1 = arith.constant 1 : index
    %c1_6 = arith.constant 1 : index
    %3 = vector.load %arg2[%c0_5, %c1, %c1_6] : memref<2x18x18xf32, #tpu.memory_space<vmem>>, vector<2x16x16xf32>
    tpu.vector_store %arg2[%c0_5, %c1, %c1_6], %2 {strides = array<i32>} : memref<2x18x18xf32, #tpu.memory_space<vmem>>, vector<2x16x16xf32>,
    return
  }
  func.func @transform_0(%arg0: i32) -> (i32, i32, i32) {
    %c0_i32 = arith.constant 0 : i32
    %c0_i32_0 = arith.constant 0 : i32
    %c0_i32_1 = arith.constant 0 : i32
    return %arg0, %c0_i32, %c0_i32_0 : i32, i32, i32
  }
  func.func @transform_1(%arg0: i32) -> (i32, i32, i32) {
    %c0_i32 = arith.constant 0 : i32
    %c0_i32_0 = arith.constant 0 : i32
    %c0_i32_1 = arith.constant 0 : i32
    return %arg0, %c0_i32, %c0_i32_0 : i32, i32, i32
  }
}

</mosaic_0001>

<bundles_post_ra>
// kernel: tpu_custom_call.1
= control target key start
LH: loop header
LB: loop body
LE: loop exit
PB: predicated region body
PF: predicated region fallthrough
CT: control target
= control target key end

     0   :  { %6 = vsyncpa [#allocation3], 0  ;;  %s492_s0 = inlined_call_operand.hbm [shape: f32[8,16,16], index: 0, kind: input, shape index: {}]   ;;  %s493_s1 = inlined_call_operand.vmem [shape: f32[8,18,18], index: 1, kind: output, shape index: {}]  }
   0x1   :  { %8 = vsyncpa [#allocation3 + $0x1], 0  ;;  %s385_s6 = smov 0   ;;  %s387_s7 = smov 0  }
   0x2   :  { %s389_s8 = smov 0   ;;  %s391_s9 = smov 0  }
   0x3 LB: > { %s244_s10 = sadd.s32 4294967295, %s368_s9   ;;  %s405_s11 = sadd.s32 1, %s368_s9   ;;  %s368_s9 = sphi %s391_s9, %s500_s9   ;;  %s364_s8 = sphi %s389_s8, %s499_s8   ;;  %s360_s7 = sphi %s387_s7, %s498_s7   ;;  %s356_s6 = sphi %s385_s6, %s497_s6  }
   0x4   : > { %s18_s12 = ssub.s32 %s368_s9, %s405_s11  ;;  %s21_s13 = sadd.s32 1, %s364_s8 }
   0x5   : > { %p19_p0 = scmp.eq.s32.totalorder %s18_s12, 0  ;;  %p28_p1 = scmp.ne.s32.totalorder %s364_s8, %s360_s7 }
   0x6   : > { %p29_p2 = scmp.eq.s32.totalorder %s368_s9, 0  ;;  %p34_p3 = scmp.ne.s32.totalorder %s360_s7, %s356_s6 }
   0x7   : > { %s415_s14 = scalar_select %p19_p0, %s364_s8, %s21_s13  }
   0x8   : > { %p30_p4 = por %p29_p2, %p28_p1  ;;  %p35_p5 = scmp.eq.s32.totalorder %s244_s10, 0 }
   0x9   : > { %p267_p6 = scmp.lt.s32.totalorder %s368_s9, 4  ;;  %s84_s16 = sand.u32 1, %s364_s8  }
   0xa   : > { %p420_p7 = por %p35_p5, %p34_p3  ;;  %s248_s17 = sshll.u32 %s84_s16, 5 }
   0xb   : > { %s259_s18 = sshll.u32 %s368_s9, 9  ;;  %s88_s22 = scalar_lea.vmem [#allocation2], %s248_s17 }
   0xc   : > { %s429_s21 = scalar_lea.hbm %s492_s0, %s259_s18  ;;  %s96_s23 = sshll.u32 %s88_s22, 4  ;;  %s431_s23 = int_to_ptr.vmem [resolvable:$true] %s96_s23 }
   0xd   : > { %p433_p8 = pnand %p267_p6, %p30_p4  ;;  %s438_s25 = scalar_lea.sflag [#allocation3], %s84_s16 }
   0xe   : > { %s304_s26 = scalar_lea.hbm %s429_s21, 512  ;;  %s309_s29 = scalar_lea.hbm %s492_s0, 2048 }
   0xf   : > { %p305_p10 = scmp.ne.s32.totalorder %s429_s21, %s304_s26  ;;  %p306_p11 = pneg %p433_p8 }
  0x10   : > { %p310_p0 = scmp.lt.u32.totalorder %s429_s21, %s492_s0  ;;  %p311_p1 = scmp.lt.u32.totalorder %s309_s29, %s304_s26 }
  0x11   : > { %p307_p12 = pnand %p306_p11, %p305_p10  ;;  %p313_p3 = scmp.lt.u32.totalorder %s304_s26, %s429_s21 }
  0x12   : > { %p312_p2 = por %p311_p1, %p310_p0 }
  0x13   : > { %p308_p13 = pneg %p307_p12 }
  0x14   : > { %p314_p4 = por %p313_p3, %p312_p2 }
  0x16   : > { %p315_p5 = pnand %p314_p4, %p308_p13 }
  0x18   : > { %318 = shalt.err (!%p315_p5)
}
  0x19   : > { %s319_s3 = scalar_lea.vmem %s431_s23, 512  ;;  %s370_s4 = smov [#allocation2]  }
  0x1a   : > { %p320_p6 = scmp.ne.s32.totalorder %s431_s23, %s319_s3  ;;  %s324_s5 = sshll.u32 %s370_s4, 4  ;;  %s325_s5 = int_to_ptr.vmem [resolvable:$false] %s324_s5 }
  0x1b   : > { %s326_s6 = scalar_lea.vmem %s325_s5, 1024  ;;  %p327_p9 = scmp.lt.s32.totalorder %s431_s23, %s325_s5 }
  0x1c   : > { %p322_p10 = pnand %p320_p6, %p306_p11  ;;  %p328_p0 = scmp.lt.s32.totalorder %s326_s6, %s319_s3 }
  0x1e   : > { %p323_p12 = pneg %p322_p10  ;;  %p329_p1 = por %p328_p0, %p327_p9 }
  0x20   : > { %p330_p2 = pnand %p329_p1, %p323_p12 }
  0x22   : > { %333 = shalt.err (!%p330_p2)
}
  0x23   : > { %s371_s12 = smov 128   ;;  %s372_s13 = smov 8  }
  0x24   : > { %266 = dma.hbm_to_vmem [thread:$0]  (!%p433_p8), %s429_s21, 512, %s431_s23, %s438_s25, %s371_s12, %s371_s12, %s372_s13  }
  0x25   : > { %p104_p11 = scmp.lt.s32.totalorder %s368_s9, 5  ;;  %p496_p13 = scmp.ge.s32.totalorder %s368_s9, 1 }
  0x27   : > { %p105_p3 = pnand %p496_p13, %p104_p11 }
  0x28   : > { %s110_s16 = sand.u32 (!%p105_p3), 1, %s360_s7  }
  0x29   : > { %108 = sbr.rel (%p105_p3) target bundleno = 171 (0xab), region = 24  ;;  %s253_s17 = sshll.u32 (!%p105_p3), %s110_s16, 5 }
  0x2a   : > { %s111_s18 = scalar_lea.sflag (!%p105_p3), [#allocation3], %s110_s16  ;;  %s114_s19 = scalar_lea.vmem (!%p105_p3), [#allocation2], %s253_s17 }
  0x30   : > { %351 = dma.done.wait (%p420_p7), %s111_s18, 512  }
  0x31   : > { %353 = vsyncadd (%p420_p7), %s111_s18, 4294966784  ;;  %s254_s20 = sshll.u32 %s244_s10, 1  ;;  %vm142_vm0 = vcmask 146432   ;;  %vm145_vm1 = vcmask 140288   ;;  %v150_v0 = vld [vmem:[%s114_s19] sm:$0xff]  ;;  %v152_v1 = vld [vmem:[%s114_s19 + $0x10] sm:$0xff] }
  0x32   : > { %p136_p9 = scmp.lt.s32.totalorder %s254_s20, 7  ;;  %s373_s25 = smov 1   ;;  %v374_v2 = vmov 0.0   ;;  %v151_v3 = vld [vmem:[%s114_s19 + $0x8] sm:$0xff]  ;;  %v153_v4 = vld [vmem:[%s114_s19 + $0x18] sm:$0xff]  ;;  %vm170_vm2 = vcmask 138248  }
  0x33   : > { %158 = vrot.lane.b32.xlu0 %v150_v0, %s373_s25  ;;  %162 = vrot.lane.b32.xlu1 %v152_v1, %s373_s25 }
  0x34   : > { %s502_s20 = smov (!%p136_p9, %s254_s20), 7 }
  0x35   : > { %s260_s21 = smul.u32 24, %s502_s20 }
  0x37   : > { %s140_s24 = scalar_lea.vmem %s493_s1, %s260_s21  ;;  %160 = vrot.lane.b32.xlu0 %v151_v3, %s373_s25  ;;  %164 = vrot.lane.b32.xlu1 %v153_v4, %s373_s25 }
  0x38   : > { %143 = vst.msk [vmem:[%s140_s24] sm:$0xff] %vm142_vm0, %v374_v2  ;;  %144 = vst.msk [vmem:[%s140_s24 + $0x8] sm:$0xff] %vm142_vm0, %v374_v2 }
  0x39   : > { %146 = vst.msk [vmem:[%s140_s24 + $0x10] sm:$0x3] %vm145_vm1, %v374_v2  ;;  %149 = vst.msk [vmem:[%s140_s24 + $0x28] sm:$0x3] %vm145_vm1, %v374_v2 }
  0x3a   : > { %147 = vst.msk [vmem:[%s140_s24 + $0x18] sm:$0xff] %vm142_vm0, %v374_v2  ;;  %148 = vst.msk [vmem:[%s140_s24 + $0x20] sm:$0xff] %vm142_vm0, %v374_v2 }
  0xa5   : > { %v159_v5 = vpop.permute.xlu0 %158  ;;  %v163_v6 = vpop.permute.xlu1 %162 }
  0xa6   : > { %171 = vst.msk [vmem:[%s140_s24 + $0x1] sm:$0xff] %vm170_vm2, %v159_v5  ;;  %173 = vst.msk [vmem:[%s140_s24 + $0x19] sm:$0xff] %vm170_vm2, %v163_v6 }
  0xa9   : > { %v161_v7 = vpop.permute.xlu0 %160  ;;  %v165_v8 = vpop.permute.xlu1 %164 }
  0xaa   : > { %172 = vst.msk [vmem:[%s140_s24 + $0x9] sm:$0xff] %vm170_vm2, %v161_v7  ;;  %174 = vst.msk [vmem:[%s140_s24 + $0x21] sm:$0xff] %vm170_vm2, %v165_v8 }
  0xab PF: > { %p11_p7 = scmp.ge.s32.totalorder %s405_s11, 6   ;;  %s497_s6 = smov %s360_s7 }
  0xac   : > { %s498_s7 = smov %s364_s8  ;;  %s499_s8 = smov %s415_s14 }
  0xad   : > { %s500_s9 = smov %s405_s11  ;;  %13 = sbr.rel (!%p11_p7) target bundleno = 3 (0x3), region = 64 }
  0xb4   :  { %199 = vsyncpa [#allocation3], 1 }
  0xb5   :  { %201 = vsyncpa [#allocation3 + $0x1], 1 }

</bundles_post_ra>
